<compile_context>
chip_gen: v7x
topology: tpu7x:2x2x1
jax: 0.10.0
libtpu: 0.0.40
codegen_flags: <defaults>
</compile_context>

<pallas_src>
import functools

import jax
import jax.numpy as jnp
import numpy as np
from jax.experimental import pallas as pl
from jax.experimental.pallas import tpu as pltpu


def _large_margin_kernel(tgt_ref, logits_ref, gram_ref, out_ref, acc_ref,
                         *, gamma, epsilon, aggregation, batch_size):
    pid = pl.program_id(0)

    @pl.when(pid == 0)
    def _init():
        acc_ref[...] = jnp.zeros_like(acc_ref)

    logits = logits_ref[...]                                   # (TB, C) f32
    tgt = tgt_ref[...]                                         # (TB, 1) i32
    tb, num_classes = logits.shape

    col = jax.lax.broadcasted_iota(jnp.int32, (tb, num_classes), 1)
    tgt_mask = col == tgt                                      # (TB, C) bool

    # row validity mask (last tile may be partial)
    row = jax.lax.broadcasted_iota(jnp.int32, (tb, 1), 0) + pid * tb
    row_ok = row < batch_size                                  # (TB, 1) bool

    # target score + confusing (runner-up) class, fused passes over C
    tgt_score = jnp.sum(jnp.where(tgt_mask, logits, 0.0), axis=1, keepdims=True)
    masked = jnp.where(tgt_mask, -jnp.inf, logits)
    conf_score = jnp.max(masked, axis=1, keepdims=True)        # = logits[i, conf_i]
    conf_idx = jnp.min(jnp.where(masked == conf_score, col, num_classes),
                       axis=1, keepdims=True)                  # first argmax (int32)
    conf_mask = col == conf_idx                                # (TB, C) bool

    # cross entropy (mean reduction accumulated as a sum)
    row_max = jnp.maximum(conf_score, tgt_score)
    lse = jnp.log(jnp.sum(jnp.exp(logits - row_max), axis=1, keepdims=True)) + row_max
    ce_rows = lse - tgt_score                                  # (TB, 1)

    # SimpleLargeMarginLoss violations
    viol = jnp.where(tgt_mask, 0.0,
                     jnp.maximum(gamma + logits - tgt_score, 0.0))
    if aggregation == 'max':
        agg_rows = jnp.max(viol, axis=1, keepdims=True)
    else:
        agg_rows = jnp.sum(viol, axis=1, keepdims=True)

    # gradient-based margin via the Gram identity
    delta = conf_mask.astype(jnp.float32) - tgt_mask.astype(jnp.float32)
    dg = jnp.dot(delta, gram_ref[...], preferred_element_type=jnp.float32)
    sq_norm = jnp.sum(dg * delta, axis=1, keepdims=True)       # ||w_c - w_t||^2
    norm = jnp.sqrt(sq_norm + epsilon) + epsilon
    score_diff = conf_score - tgt_score
    violation = jnp.maximum(gamma + score_diff / norm, 0.0)
    valid = score_diff > (-2.0 * gamma)                        # (TB, 1) bool

    # per-tile partial sums -> resident (1, 4) VMEM accumulator
    acc_ref[0:1, 0:1] += jnp.sum(jnp.where(row_ok, ce_rows, 0.0), keepdims=True)
    acc_ref[0:1, 1:2] += jnp.sum(jnp.where(row_ok, agg_rows, 0.0), keepdims=True)
    acc_ref[0:1, 2:3] += jnp.sum(jnp.where(row_ok & valid, violation, 0.0),
                                 keepdims=True)
    acc_ref[0:1, 3:4] += jnp.sum((row_ok & valid).astype(jnp.float32),
                                 keepdims=True)

    @pl.when(pid == pl.num_programs(0) - 1)
    def _finalize():
        inv_b = 1.0 / float(batch_size)
        ce = acc_ref[0:1, 0:1] * inv_b                         # (1, 1)
        simple = 0.8 * ce + 0.2 * (acc_ref[0:1, 1:2] * inv_b)
        vc = acc_ref[0:1, 3:4]
        margin = acc_ref[0:1, 2:3] / jnp.maximum(vc, 1.0)
        total = jnp.where(vc > 0.0,
                          0.6 * ce + 0.2 * simple + 0.2 * margin,
                          0.8 * ce + 0.2 * simple)
        out_ref[0:1, 0:1] = total
        out_ref[0:1, 1:2] = ce


def _pick_tile_b(batch, n_classes):
    # Keep each (tile_b, C) f32 logits block near ~4 MiB so two pipeline
    # buffers + the resident Gram matrix stay well inside v7x's 64 MiB VMEM.
    budget_rows = max(8, (4 * 1024 * 1024) // max(4 * n_classes, 1))
    if batch <= budget_rows:
        return batch                        # full-dim block is always legal
    return max(8, (budget_rows // 8) * 8)   # multiple of 8 sublanes


def large_margin_loss(logits, targets, weight, *, gamma=1.0, aggregation='max',
                      epsilon=1e-6, training=True):
    """weight: (D, C) linear-head weight so that logits = activations @ weight."""
    B, C = logits.shape
    logits = logits.astype(jnp.float32)
    targets2d = targets.astype(jnp.int32).reshape(B, 1)

    # Gram matrix G = W^T W (C, C); contracting dim 0 on both operands avoids
    # materializing weight.T in HBM.
    w = jnp.asarray(weight, jnp.float32)
    gram = jax.lax.dot_general(w, w, dimension_numbers=(((0,), (0,)), ((), ())),
                               precision=jax.lax.Precision.HIGHEST)

    tile_b = _pick_tile_b(B, C)
    nb = pl.cdiv(B, tile_b)

    kernel = functools.partial(_large_margin_kernel, gamma=float(gamma),
                               epsilon=float(epsilon), aggregation=aggregation,
                               batch_size=B)
    out = pl.pallas_call(
        kernel,
        grid=(nb,),
        in_specs=[pl.BlockSpec((tile_b, 1), lambda i: (i, 0)),   # targets (int32)
                  pl.BlockSpec((tile_b, C), lambda i: (i, 0)),   # logits
                  pl.BlockSpec((C, C), lambda i: (0, 0))],       # Gram (resident)
        out_specs=pl.BlockSpec((1, 2), lambda i: (0, 0)),
        out_shape=jax.ShapeDtypeStruct((1, 2), jnp.float32),
        scratch_shapes=[pltpu.VMEM((1, 4), jnp.float32)],
        compiler_params=pltpu.CompilerParams(
            dimension_semantics=("arbitrary",),
            vmem_limit_bytes=48 * 1024 * 1024),
    )(targets2d, logits, gram)

    # eval / no-activation path of the PyTorch module: plain cross entropy
    return out[0, 0] if training else out[0, 1]


def _reference(logits, targets, weight, gamma=1.0, eps=1e-6):
    """Pure-JAX mirror of LargeMarginLoss.forward (training, linear head)."""
    B, C = logits.shape
    onehot = jax.nn.one_hot(targets, C, dtype=jnp.float32)
    logp = jax.nn.log_softmax(logits, axis=1)
    ce = -jnp.mean(jnp.sum(logp * onehot, axis=1))
    correct = jnp.sum(logits * onehot, axis=1, keepdims=True)
    viol = jnp.maximum((gamma + logits - correct) * (1.0 - onehot), 0.0)
    simple = 0.8 * ce + 0.2 * jnp.mean(jnp.max(viol, axis=1))
    masked = jnp.where(onehot > 0, -jnp.inf, logits)
    conf = jnp.argmax(masked, axis=1)
    conf_score = jnp.take_along_axis(logits, conf[:, None], axis=1)[:, 0]
    score_diff = conf_score - correct[:, 0]
    grad_diff = weight.T[conf] - weight.T[targets]                       # (B, D)
    norm = jnp.sqrt(jnp.sum(grad_diff ** 2, axis=1) + eps) + eps
    violation = jnp.maximum(gamma + score_diff / norm, 0.0)
    valid = score_diff > -2.0 * gamma
    vc = jnp.sum(valid.astype(jnp.float32))
    margin = jnp.sum(jnp.where(valid, violation, 0.0)) / jnp.maximum(vc, 1.0)
    return jnp.where(vc > 0,
                     0.6 * ce + 0.2 * simple + 0.2 * margin,
                     0.8 * ce + 0.2 * simple)


if __name__ == "__main__":
    B, D, C = 8, 32, 16
    key = jax.random.PRNGKey(0)
    k_act, k_w, k_tgt = jax.random.split(key, 3)

    layer_activations = jax.random.normal(k_act, (B, D), dtype=jnp.float32)
    weight = 0.1 * jax.random.normal(k_w, (D, C), dtype=jnp.float32)     # synthetic linear head
    targets = jax.random.randint(k_tgt, (B,), 0, C, dtype=jnp.int32)
    logits = layer_activations @ weight                                  # (B, C)

    out = large_margin_loss(logits, targets, weight, training=True)
    out = jax.block_until_ready(out)

    ref = _reference(logits, targets, weight)
    np.testing.assert_allclose(np.asarray(out), np.asarray(ref), rtol=1e-4, atol=1e-5)

    print("KERNEL_OK")
</pallas_src>

<mosaic_0001>
module attributes {stable_mosaic.version = 11 : i64} {
  func.func @_large_margin_kernel(%arg0: i32, %arg1: memref<8x1xi32, #tpu.memory_space<vmem>>, %arg2: memref<8x16xf32, #tpu.memory_space<vmem>>, %arg3: memref<16x16xf32, #tpu.memory_space<vmem>>, %arg4: memref<1x2xf32, #tpu.memory_space<vmem>>, %arg5: memref<1x4xf32, #tpu.memory_space<vmem>>) attributes {dimension_semantics = [#tpu.dimension_semantics<arbitrary>], iteration_bounds = array<i64: 1>, scalar_prefetch = 0 : i64, scratch_operands = 1 : i64, tpu.core_type = #tpu.core_type<tc>, window_params = [{transform_indices = @transform_0, window_bounds = array<i64: 8, 1>}, {transform_indices = @transform_1, window_bounds = array<i64: 8, 16>}, {pipeline_mode = #tpu.pipeline_mode<synchronous>, transform_indices = @transform_2, window_bounds = array<i64: 16, 16>}, {pipeline_mode = #tpu.pipeline_mode<synchronous>, transform_indices = @transform_3, window_bounds = array<i64: 1, 2>}]} {
    %c0_i32 = arith.constant 0 : i32
    %0 = arith.cmpi eq, %arg0, %c0_i32 : i32
    %1 = arith.extui %0 : i1 to i32
    %c0_i32_0 = arith.constant 0 : i32
    %2 = arith.cmpi ne, %1, %c0_i32_0 : i32
    scf.if %2 {
      %cst_45 = arith.constant 0.000000e+00 : f32
      %117 = vector.broadcast %cst_45 : f32 to vector<1x4xf32>
      %c0_46 = arith.constant 0 : index
      %c0_47 = arith.constant 0 : index
      %118 = vector.load %arg5[%c0_46, %c0_47] : memref<1x4xf32, #tpu.memory_space<vmem>>, vector<1x4xf32>
      tpu.vector_store %arg5[%c0_46, %c0_47], %117 {strides = array<i32>} : memref<1x4xf32, #tpu.memory_space<vmem>>, vector<1x4xf32>,
    } else {
    }
    %c0 = arith.constant 0 : index
    %c0_1 = arith.constant 0 : index
    %3 = vector.load %arg2[%c0, %c0_1] : memref<8x16xf32, #tpu.memory_space<vmem>>, vector<8x16xf32>
    %c0_2 = arith.constant 0 : index
    %c0_3 = arith.constant 0 : index
    %4 = vector.load %arg1[%c0_2, %c0_3] : memref<8x1xi32, #tpu.memory_space<vmem>>, vector<8x1xi32>
    %5 = tpu.iota {dimensions = array<i32: 1>} : vector<8x16xi32>
    %6 = vector.broadcast %4 : vector<8x1xi32> to vector<8x16xi32>
    %7 = arith.cmpi eq, %5, %6 : vector<8x16xi32>
    %8 = tpu.iota {dimensions = array<i32: 0>} : vector<8x1xi32>
    %c8_i32 = arith.constant 8 : i32
    %9 = arith.muli %arg0, %c8_i32 : i32
    %10 = vector.broadcast %9 : i32 to vector<8x1xi32>
    %11 = arith.addi %8, %10 : vector<8x1xi32>
    %c8_i32_4 = arith.constant 8 : i32
    %12 = vector.broadcast %c8_i32_4 : i32 to vector<8x1xi32>
    %13 = arith.cmpi slt, %11, %12 : vector<8x1xi32>
    %cst = arith.constant 0.000000e+00 : f32
    %14 = vector.broadcast %cst : f32 to vector<8x16xf32>
    %15 = arith.select %7, %3, %14 : vector<8x16xi1>, vector<8x16xf32>
    %cst_5 = arith.constant dense<0.000000e+00> : vector<8xf32>
    %16 = vector.multi_reduction <add>, %15, %cst_5 [1] : vector<8x16xf32> to vector<8xf32>
    %17 = vector.shape_cast %16 : vector<8xf32> to vector<8x1xf32>
    %cst_6 = arith.constant 0xFF800000 : f32
    %18 = vector.broadcast %cst_6 : f32 to vector<8x16xf32>
    %19 = arith.select %7, %18, %3 : vector<8x16xi1>, vector<8x16xf32>
    %cst_7 = arith.constant dense<0xFF800000> : vector<8xf32>
    %20 = vector.multi_reduction <maximumf>, %19, %cst_7 [1] : vector<8x16xf32> to vector<8xf32>
    %21 = vector.shape_cast %20 : vector<8xf32> to vector<8x1xf32>
    %22 = vector.broadcast %21 : vector<8x1xf32> to vector<8x16xf32>
    %23 = arith.cmpf oeq, %19, %22 : vector<8x16xf32>
    %c16_i32 = arith.constant 16 : i32
    %24 = vector.broadcast %c16_i32 : i32 to vector<8x16xi32>
    %25 = arith.select %23, %5, %24 : vector<8x16xi1>, vector<8x16xi32>
    %cst_8 = arith.constant dense<2147483647> : vector<8xi32>
    %26 = vector.multi_reduction <minsi>, %25, %cst_8 [1] : vector<8x16xi32> to vector<8xi32>
    %27 = vector.shape_cast %26 : vector<8xi32> to vector<8x1xi32>
    %28 = vector.broadcast %27 : vector<8x1xi32> to vector<8x16xi32>
    %29 = arith.cmpi eq, %5, %28 : vector<8x16xi32>
    %30 = arith.maximumf %21, %17 : vector<8x1xf32>
    %31 = vector.broadcast %30 : vector<8x1xf32> to vector<8x16xf32>
    %32 = arith.subf %3, %31 : vector<8x16xf32>
    %33 = math.exp %32 : vector<8x16xf32>
    %cst_9 = arith.constant dense<0.000000e+00> : vector<8xf32>
    %34 = vector.multi_reduction <add>, %33, %cst_9 [1] : vector<8x16xf32> to vector<8xf32>
    %35 = vector.shape_cast %34 : vector<8xf32> to vector<8x1xf32>
    %36 = math.log %35 : vector<8x1xf32>
    %37 = arith.addf %36, %30 : vector<8x1xf32>
    %38 = arith.subf %37, %17 : vector<8x1xf32>
    %cst_10 = arith.constant 1.000000e+00 : f32
    %39 = vector.broadcast %cst_10 : f32 to vector<8x16xf32>
    %40 = arith.addf %39, %3 : vector<8x16xf32>
    %41 = vector.broadcast %17 : vector<8x1xf32> to vector<8x16xf32>
    %42 = arith.subf %40, %41 : vector<8x16xf32>
    %cst_11 = arith.constant 0.000000e+00 : f32
    %43 = vector.broadcast %cst_11 : f32 to vector<8x16xf32>
    %44 = arith.maximumf %42, %43 : vector<8x16xf32>
    %cst_12 = arith.constant 0.000000e+00 : f32
    %45 = vector.broadcast %cst_12 : f32 to vector<8x16xf32>
    %46 = arith.select %7, %45, %44 : vector<8x16xi1>, vector<8x16xf32>
    %cst_13 = arith.constant dense<0xFF800000> : vector<8xf32>
    %47 = vector.multi_reduction <maximumf>, %46, %cst_13 [1] : vector<8x16xf32> to vector<8xf32>
    %48 = vector.shape_cast %47 : vector<8xf32> to vector<8x1xf32>
    %49 = arith.extui %29 : vector<8x16xi1> to vector<8x16xi32>
    %50 = arith.sitofp %49 : vector<8x16xi32> to vector<8x16xf32>
    %51 = arith.extui %7 : vector<8x16xi1> to vector<8x16xi32>
    %52 = arith.sitofp %51 : vector<8x16xi32> to vector<8x16xf32>
    %53 = arith.subf %50, %52 : vector<8x16xf32>
    %c0_14 = arith.constant 0 : index
    %c0_15 = arith.constant 0 : index
    %54 = vector.load %arg3[%c0_14, %c0_15] : memref<16x16xf32, #tpu.memory_space<vmem>>, vector<16x16xf32>
    %cst_16 = arith.constant dense<0.000000e+00> : vector<8x16xf32>
    %55 = tpu.matmul %53, %54, %cst_16 {dimension_numbers = #tpu.dot_dimension_numbers<[1], [0], [0], [1], [0, 0, 1, 1], [], []>} : vector<8x16xf32>, vector<16x16xf32>, vector<8x16xf32> -> vector<8x16xf32>
    %56 = arith.mulf %55, %53 : vector<8x16xf32>
    %cst_17 = arith.constant dense<0.000000e+00> : vector<8xf32>
    %57 = vector.multi_reduction <add>, %56, %cst_17 [1] : vector<8x16xf32> to vector<8xf32>
    %58 = vector.shape_cast %57 : vector<8xf32> to vector<8x1xf32>
    %cst_18 = arith.constant 9.99999997E-7 : f32
    %59 = vector.broadcast %cst_18 : f32 to vector<8x1xf32>
    %60 = arith.addf %58, %59 : vector<8x1xf32>
    %61 = math.sqrt %60 : vector<8x1xf32>
    %cst_19 = arith.constant 9.99999997E-7 : f32
    %62 = vector.broadcast %cst_19 : f32 to vector<8x1xf32>
    %63 = arith.addf %61, %62 : vector<8x1xf32>
    %64 = arith.subf %21, %17 : vector<8x1xf32>
    %65 = arith.divf %64, %63 : vector<8x1xf32>
    %cst_20 = arith.constant 1.000000e+00 : f32
    %66 = vector.broadcast %cst_20 : f32 to vector<8x1xf32>
    %67 = arith.addf %66, %65 : vector<8x1xf32>
    %cst_21 = arith.constant 0.000000e+00 : f32
    %68 = vector.broadcast %cst_21 : f32 to vector<8x1xf32>
    %69 = arith.maximumf %67, %68 : vector<8x1xf32>
    %cst_22 = arith.constant -2.000000e+00 : f32
    %70 = vector.broadcast %cst_22 : f32 to vector<8x1xf32>
    %71 = arith.cmpf ogt, %64, %70 : vector<8x1xf32>
    %c0_23 = arith.constant 0 : index
    %c0_24 = arith.constant 0 : index
    %72 = vector.load %arg5[%c0_23, %c0_24] : memref<1x4xf32, #tpu.memory_space<vmem>>, vector<1x1xf32>
    %cst_25 = arith.constant 0.000000e+00 : f32
    %73 = vector.broadcast %cst_25 : f32 to vector<8x1xf32>
    %74 = arith.select %13, %38, %73 : vector<8x1xi1>, vector<8x1xf32>
    %75 = vector.shape_cast %74 : vector<8x1xf32> to vector<1x8x1xf32>
    %cst_26 = arith.constant dense<0.000000e+00> : vector<1xf32>
    %76 = vector.multi_reduction <add>, %75, %cst_26 [1, 2] : vector<1x8x1xf32> to vector<1xf32>
    %77 = vector.shape_cast %76 : vector<1xf32> to vector<1x1x1xf32>
    %78 = vector.extract %77[0, 0, 0] : f32 from vector<1x1x1xf32>
    %79 = vector.broadcast %78 : f32 to vector<1x1xf32>
    %80 = arith.addf %72, %79 : vector<1x1xf32>
    %c0_27 = arith.constant 0 : index
    %c0_28 = arith.constant 0 : index
    %81 = vector.load %arg5[%c0_27, %c0_28] : memref<1x4xf32, #tpu.memory_space<vmem>>, vector<1x1xf32>
    tpu.vector_store %arg5[%c0_27, %c0_28], %80 {strides = array<i32>} : memref<1x4xf32, #tpu.memory_space<vmem>>, vector<1x1xf32>,
    %c0_29 = arith.constant 0 : index
    %c1 = arith.constant 1 : index
    %82 = vector.load %arg5[%c0_29, %c1] : memref<1x4xf32, #tpu.memory_space<vmem>>, vector<1x1xf32>
    %cst_30 = arith.constant 0.000000e+00 : f32
    %83 = vector.broadcast %cst_30 : f32 to vector<8x1xf32>
    %84 = arith.select %13, %48, %83 : vector<8x1xi1>, vector<8x1xf32>
    %85 = vector.shape_cast %84 : vector<8x1xf32> to vector<1x8x1xf32>
    %cst_31 = arith.constant dense<0.000000e+00> : vector<1xf32>
    %86 = vector.multi_reduction <add>, %85, %cst_31 [1, 2] : vector<1x8x1xf32> to vector<1xf32>
    %87 = vector.shape_cast %86 : vector<1xf32> to vector<1x1x1xf32>
    %88 = vector.extract %87[0, 0, 0] : f32 from vector<1x1x1xf32>
    %89 = vector.broadcast %88 : f32 to vector<1x1xf32>
    %90 = arith.addf %82, %89 : vector<1x1xf32>
    %c0_32 = arith.constant 0 : index
    %c1_33 = arith.constant 1 : index
    %91 = vector.load %arg5[%c0_32, %c1_33] : memref<1x4xf32, #tpu.memory_space<vmem>>, vector<1x1xf32>
    tpu.vector_store %arg5[%c0_32, %c1_33], %90 {strides = array<i32>} : memref<1x4xf32, #tpu.memory_space<vmem>>, vector<1x1xf32>,
    %c0_34 = arith.constant 0 : index
    %c2 = arith.constant 2 : index
    %92 = vector.load %arg5[%c0_34, %c2] : memref<1x4xf32, #tpu.memory_space<vmem>>, vector<1x1xf32>
    %93 = arith.andi %13, %71 : vector<8x1xi1>
    %cst_35 = arith.constant 0.000000e+00 : f32
    %94 = vector.broadcast %cst_35 : f32 to vector<8x1xf32>
    %95 = arith.select %93, %69, %94 : vector<8x1xi1>, vector<8x1xf32>
    %96 = vector.shape_cast %95 : vector<8x1xf32> to vector<1x8x1xf32>
    %cst_36 = arith.constant dense<0.000000e+00> : vector<1xf32>
    %97 = vector.multi_reduction <add>, %96, %cst_36 [1, 2] : vector<1x8x1xf32> to vector<1xf32>
    %98 = vector.shape_cast %97 : vector<1xf32> to vector<1x1x1xf32>
    %99 = vector.extract %98[0, 0, 0] : f32 from vector<1x1x1xf32>
    %100 = vector.broadcast %99 : f32 to vector<1x1xf32>
    %101 = arith.addf %92, %100 : vector<1x1xf32>
    %c0_37 = arith.constant 0 : index
    %c2_38 = arith.constant 2 : index
    %102 = vector.load %arg5[%c0_37, %c2_38] : memref<1x4xf32, #tpu.memory_space<vmem>>, vector<1x1xf32>
    tpu.vector_store %arg5[%c0_37, %c2_38], %101 {strides = array<i32>} : memref<1x4xf32, #tpu.memory_space<vmem>>, vector<1x1xf32>,
    %c0_39 = arith.constant 0 : index
    %c3 = arith.constant 3 : index
    %103 = vector.load %arg5[%c0_39, %c3] : memref<1x4xf32, #tpu.memory_space<vmem>>, vector<1x1xf32>
    %104 = arith.andi %13, %71 : vector<8x1xi1>
    %105 = arith.extui %104 : vector<8x1xi1> to vector<8x1xi32>
    %106 = arith.sitofp %105 : vector<8x1xi32> to vector<8x1xf32>
    %107 = vector.shape_cast %106 : vector<8x1xf32> to vector<1x8x1xf32>
    %cst_40 = arith.constant dense<0.000000e+00> : vector<1xf32>
    %108 = vector.multi_reduction <add>, %107, %cst_40 [1, 2] : vector<1x8x1xf32> to vector<1xf32>
    %109 = vector.shape_cast %108 : vector<1xf32> to vector<1x1x1xf32>
    %110 = vector.extract %109[0, 0, 0] : f32 from vector<1x1x1xf32>
    %111 = vector.broadcast %110 : f32 to vector<1x1xf32>
    %112 = arith.addf %103, %111 : vector<1x1xf32>
    %c0_41 = arith.constant 0 : index
    %c3_42 = arith.constant 3 : index
    %113 = vector.load %arg5[%c0_41, %c3_42] : memref<1x4xf32, #tpu.memory_space<vmem>>, vector<1x1xf32>
    tpu.vector_store %arg5[%c0_41, %c3_42], %112 {strides = array<i32>} : memref<1x4xf32, #tpu.memory_space<vmem>>, vector<1x1xf32>,
    %c0_i32_43 = arith.constant 0 : i32
    %114 = arith.cmpi eq, %arg0, %c0_i32_43 : i32
    %115 = arith.extui %114 : i1 to i32
    %c0_i32_44 = arith.constant 0 : i32
    %116 = arith.cmpi ne, %115, %c0_i32_44 : i32
    scf.if %116 {
      %c0_45 = arith.constant 0 : index
      %c0_46 = arith.constant 0 : index
      %117 = vector.load %arg5[%c0_45, %c0_46] : memref<1x4xf32, #tpu.memory_space<vmem>>, vector<1x1xf32>
      %cst_47 = arith.constant 1.250000e-01 : f32
      %118 = vector.broadcast %cst_47 : f32 to vector<1x1xf32>
      %119 = arith.mulf %117, %118 : vector<1x1xf32>
      %cst_48 = arith.constant 8.000000e-01 : f32
      %120 = vector.broadcast %cst_48 : f32 to vector<1x1xf32>
      %121 = arith.mulf %120, %119 : vector<1x1xf32>
      %c0_49 = arith.constant 0 : index
      %c1_50 = arith.constant 1 : index
      %122 = vector.load %arg5[%c0_49, %c1_50] : memref<1x4xf32, #tpu.memory_space<vmem>>, vector<1x1xf32>
      %cst_51 = arith.constant 1.250000e-01 : f32
      %123 = vector.broadcast %cst_51 : f32 to vector<1x1xf32>
      %124 = arith.mulf %122, %123 : vector<1x1xf32>
      %cst_52 = arith.constant 2.000000e-01 : f32
      %125 = vector.broadcast %cst_52 : f32 to vector<1x1xf32>
      %126 = arith.mulf %125, %124 : vector<1x1xf32>
      %127 = arith.addf %121, %126 : vector<1x1xf32>
      %c0_53 = arith.constant 0 : index
      %c3_54 = arith.constant 3 : index
      %128 = vector.load %arg5[%c0_53, %c3_54] : memref<1x4xf32, #tpu.memory_space<vmem>>, vector<1x1xf32>
      %c0_55 = arith.constant 0 : index
      %c2_56 = arith.constant 2 : index
      %129 = vector.load %arg5[%c0_55, %c2_56] : memref<1x4xf32, #tpu.memory_space<vmem>>, vector<1x1xf32>
      %cst_57 = arith.constant 1.000000e+00 : f32
      %130 = vector.broadcast %cst_57 : f32 to vector<1x1xf32>
      %131 = arith.maximumf %128, %130 : vector<1x1xf32>
      %132 = arith.divf %129, %131 : vector<1x1xf32>
      %cst_58 = arith.constant 0.000000e+00 : f32
      %133 = vector.broadcast %cst_58 : f32 to vector<1x1xf32>
      %134 = arith.cmpf ogt, %128, %133 : vector<1x1xf32>
      %cst_59 = arith.constant 6.000000e-01 : f32
      %135 = vector.broadcast %cst_59 : f32 to vector<1x1xf32>
      %136 = arith.mulf %135, %119 : vector<1x1xf32>
      %cst_60 = arith.constant 2.000000e-01 : f32
      %137 = vector.broadcast %cst_60 : f32 to vector<1x1xf32>
      %138 = arith.mulf %137, %127 : vector<1x1xf32>
      %139 = arith.addf %136, %138 : vector<1x1xf32>
      %cst_61 = arith.constant 2.000000e-01 : f32
      %140 = vector.broadcast %cst_61 : f32 to vector<1x1xf32>
      %141 = arith.mulf %140, %132 : vector<1x1xf32>
      %142 = arith.addf %139, %141 : vector<1x1xf32>
      %cst_62 = arith.constant 8.000000e-01 : f32
      %143 = vector.broadcast %cst_62 : f32 to vector<1x1xf32>
      %144 = arith.mulf %143, %119 : vector<1x1xf32>
      %cst_63 = arith.constant 2.000000e-01 : f32
      %145 = vector.broadcast %cst_63 : f32 to vector<1x1xf32>
      %146 = arith.mulf %145, %127 : vector<1x1xf32>
      %147 = arith.addf %144, %146 : vector<1x1xf32>
      %148 = arith.select %134, %142, %147 : vector<1x1xi1>, vector<1x1xf32>
      %c0_64 = arith.constant 0 : index
      %c0_65 = arith.constant 0 : index
      %149 = vector.load %arg4[%c0_64, %c0_65] : memref<1x2xf32, #tpu.memory_space<vmem>>, vector<1x1xf32>
      tpu.vector_store %arg4[%c0_64, %c0_65], %148 {strides = array<i32>} : memref<1x2xf32, #tpu.memory_space<vmem>>, vector<1x1xf32>,
      %c0_66 = arith.constant 0 : index
      %c1_67 = arith.constant 1 : index
      %150 = vector.load %arg4[%c0_66, %c1_67] : memref<1x2xf32, #tpu.memory_space<vmem>>, vector<1x1xf32>
      tpu.vector_store %arg4[%c0_66, %c1_67], %119 {strides = array<i32>} : memref<1x2xf32, #tpu.memory_space<vmem>>, vector<1x1xf32>,
    } else {
    }
    return
  }
  func.func @transform_0(%arg0: i32) -> (i32, i32) {
    %c0_i32 = arith.constant 0 : i32
    %c0_i32_0 = arith.constant 0 : i32
    return %arg0, %c0_i32 : i32, i32
  }
  func.func @transform_1(%arg0: i32) -> (i32, i32) {
    %c0_i32 = arith.constant 0 : i32
    %c0_i32_0 = arith.constant 0 : i32
    return %arg0, %c0_i32 : i32, i32
  }
  func.func @transform_2(%arg0: i32) -> (i32, i32) {
    %c0_i32 = arith.constant 0 : i32
    %c0_i32_0 = arith.constant 0 : i32
    %c0_i32_1 = arith.constant 0 : i32
    return %c0_i32, %c0_i32_0 : i32, i32
  }
  func.func @transform_3(%arg0: i32) -> (i32, i32) {
    %c0_i32 = arith.constant 0 : i32
    %c0_i32_0 = arith.constant 0 : i32
    %c0_i32_1 = arith.constant 0 : i32
    return %c0_i32, %c0_i32_0 : i32, i32
  }
}

</mosaic_0001>

<bundles_post_ra>
// kernel: tpu_custom_call.1
= control target key start
LH: loop header
LB: loop body
LE: loop exit
PB: predicated region body
PF: predicated region fallthrough
CT: control target
= control target key end

     0   :  { %8 = vsyncpa [#allocation4], 0  ;;  %s534_s0 = inlined_call_operand.vmem [shape: s32[8,1], index: 0, kind: input, shape index: {}]   ;;  %s535_s1 = inlined_call_operand.hbm [shape: f32[8,16], index: 1, kind: input, shape index: {}]   ;;  %s536_s2 = inlined_call_operand.vmem [shape: f32[16,16], index: 2, kind: input, shape index: {}]   ;;  %s537_s3 = inlined_call_operand.hbm [shape: f32[1,2], index: 3, kind: output, shape index: {}]  }
   0x1   :  { %9 = vsyncpa [#allocation5], 0  ;;  %s425_s12 = smov [#allocation3]   ;;  %s377_s16 = scalar_lea.hbm %s535_s1, 128 }
   0x2   :  { %s18_s13 = sshll.u32 %s425_s12, 4  ;;  %p378_p0 = scmp.ne.s32.totalorder %s535_s1, %s377_s16  ;;  %s19_s13 = int_to_ptr.vmem [resolvable:$true] %s18_s13 }
   0x3   :  { %p381_p1 = scmp.lt.u32.totalorder %s377_s16, %s535_s1 }
   0x5   :  { %p383_p2 = pnand %p381_p1, %p378_p0 }
   0x7   :  { %386 = shalt.err (!%p383_p2)
}
   0x8   :  { %s387_s21 = scalar_lea.vmem %s19_s13, 128  ;;  %p392_p4 = scmp.lt.s32.totalorder %s19_s13, %s19_s13 }
   0x9   :  { %p388_p3 = scmp.ne.s32.totalorder %s19_s13, %s387_s21  ;;  %p393_p5 = scmp.lt.s32.totalorder %s387_s21, %s387_s21 }
   0xb   :  { %p394_p6 = por %p393_p5, %p392_p4 }
   0xd   :  { %p395_p7 = pnand %p394_p6, %p388_p3 }
   0xf   :  { %398 = shalt.err (!%p395_p7)
}
  0x10   :  { %21 = dma.hbm_to_vmem [thread:$0]  %s535_s1, 128, %s19_s13, [#allocation4]  }
  0x11   :  { %421 = dma.done.wait [#allocation4], 128  }
  0x12   :  { %422 = vsyncadd [#allocation4], 4294967168  ;;  %vm31_vm0 = vcmask 24576   ;;  %v426_v0 = vmov 0   ;;  %v427_v1 = vmov 0.0   ;;  %v34_v2 = vld [vmem:[%s534_s0] sm:$0xff]  ;;  %v35_v3 = vlaneseq }
  0x13   :  { %366 = vset.pattern.permute.xlu0 %v426_v0  ;;  %32 = vst.msk [vmem:[#allocation2] sm:$0x1] %vm31_vm0, %v427_v1  ;;  %v33_v5 = vld [vmem:[#allocation3] sm:$0xff]  ;;  %vm48_vm1 = vcmask 130048   ;;  %v98_v21 = vld [vmem:[%s536_s2 + $0x8] sm:$0xff]  ;;  %v428_v23 = vmov 0.0|0.0  }
  0x14   :  { %38 = vperm.xlu0 %366, %v34_v2   ;;  %v472_v4 = vand.u32 127, %v35_v3  ;;  %v97_v20 = vld [vmem:[%s536_s2] sm:$0xff]  ;;  %344 = vmatprep.subr.bf16.mxu0 %v428_v23  ;;  %vm429_vm5 = vmmov 0   ;;  %vm193_vm7 = vcmask 7168   ;;  %v85_v42 = vadd.f32 1.0, %v33_v5  ;;  %s430_s4 = smov 127  }
  0x15   :  { %v345_v22 = vpack.c.bf16 %v98_v21, %v97_v20  ;;  %341 = vmatprep.mubr.msk.f32.mxu0 %vm429_vm5, %v427_v1  ;;  %vm206_vm11 = vcmask 0   ;;  %vm222_vm12 = vcmask 8200   ;;  %vm239_vm13 = vcmask 16400   ;;  %s431_s5 = smov 3   ;;  %s432_s6 = smov 1  }
  0x16   :  { %vm256_vm14 = vcmask 24600   ;;  %s433_s7 = smov 126   ;;  %s434_s8 = smov 125  }
  0x17   :  { %346 = vmatpush3.bf16.msra.mxu0 %v345_v22  ;;  %s435_s9 = smov [#allocation6]  }
  0x18   :  { %s321_s10 = sshll.u32 %s435_s9, 4  ;;  %s322_s10 = int_to_ptr.vmem [resolvable:$true] %s321_s10 }
  0x19   :  { %s399_s11 = scalar_lea.vmem %s322_s10, 16  ;;  %s403_s12 = scalar_lea.vmem %s322_s10, 32 }
  0x1a   :  { %p400_p8 = scmp.ne.s32.totalorder %s322_s10, %s399_s11  ;;  %p404_p9 = scmp.lt.s32.totalorder %s322_s10, %s322_s10 }
  0x1b   :  { %p405_p10 = scmp.lt.s32.totalorder %s403_s12, %s399_s11 }
  0x1d   :  { %p406_p11 = por %p405_p10, %p404_p9 }
  0x1f   :  { %p407_p12 = pnand %p406_p11, %p400_p8 }
  0x93   :  { %v474_v6 = vpop.permute.xlu0 %38 }
  0x94   :  { %vm40_vm2 = vcmp.eq.s32.totalorder %v472_v4, %v474_v6 }
  0x95   :  { %v52_v7 = vsel %vm40_vm2, -inf, %v33_v5  ;;  %v47_v18 = vsel %vm40_vm2, %v33_v5, 0.0  ;;  %v331_v32 = vsel %vm40_vm2, 1.0, %v427_v1 }
  0x96   :  { %v53_v8 = vsel %vm48_vm1, %v52_v7, -inf  ;;  %v49_v19 = vsel %vm48_vm1, %v47_v18, 0.0 }
  0x97   :  { %54 = vmax.xlane.f32.xlu0 %v53_v8 }
 0x124   :  { %v55_v9 = vpop.xlane.xlu0 %54 }
 0x125   :  { %vm56_vm3 = vcmp.eq.f32.partialorder %v52_v7, %v55_v9 }
 0x126   :  { %v57_v10 = vsel %vm56_vm3, %v472_v4, 16 }
 0x127   :  { %v58_v11 = vsel %vm48_vm1, %v57_v10, 2147483647 }
 0x128   :  { %v60_v12 = vshra.s32 %v58_v11, 16  ;;  %v59_v14 = vand.u32 65535, %v58_v11 }
 0x12a   :  { %v62_v13 = vcvt.s32.f32 %v60_v12  ;;  %v61_v16 = vcvt.s32.f32 %v59_v14 }
 0x12c   :  { %63 = vmin.xlane.f32.xlu1 %v62_v13 }
 0x1b9   :  { %v64_v15 = vpop.xlane.xlu1 %63 }
 0x1ba   :  { %vm65_vm4 = vcmp.eq.f32.partialorder %v62_v13, %v64_v15  ;;  %v70_v24 = vcvt.f32.s32 %v64_v15 }
 0x1bb   :  { %v66_v17 = vsel %vm65_vm4, %v61_v16, inf  ;;  %v191_v16 = vld [vmem:[#allocation2] sm:$0x1] }
 0x1bc   :  { %67 = vmin.xlane.f32.xlu1 %v66_v17  ;;  %v71_v26 = vshll.u32 %v70_v24, 16 }
 0x1c0   :  { %50 = vadd.xlane.f32.xlu1 %v49_v19 }
 0x249   :  { %v68_v25 = vpop.xlane.xlu1 %67 }
 0x24a   :  { %v69_v27 = vcvt.f32.s32 %v68_v25 }
 0x24c   :  { %v72_v28 = vadd.s32 %v71_v26, %v69_v27 }
 0x24d   :  { %v51_v29 = vpop.xlane.xlu1 %50 }
 0x24e   :  { %vm73_vm6 = vcmp.eq.s32.totalorder %v472_v4, %v72_v28  ;;  %v74_v30 = vmax.f32 %v55_v9, %v51_v29  ;;  %v495_v31 = vsub.f32 %v55_v9, %v51_v29  ;;  %v86_v44 = vsub.f32 %v85_v42, %v51_v29 }
 0x24f   :  { %v330_v33 = vsel %vm73_vm6, 1.0, %v427_v1 }
 0x250   :  { %v96_v34 = vsub.f32 %v330_v33, %v331_v32  ;;  %v75_v35 = vsub.f32 %v33_v5, %v74_v30  ;;  %vm190_vm8 = vcmp.gt.f32.partialorder %v495_v31, -2.0  ;;  %v87_v47 = vmax.f32 %v86_v44, 0.0 }
 0x251   :  { %v333_v36 = vsel %vm190_vm8, 1.0, %v427_v1 }
 0x252   :  { %v76_v37 = vmul.f32 1.442695, %v75_v35  ;;  %342 = vmatmul.mubr.msk.f32.vlgmr.msra.gmra.mrb[0].mxu0 %vm48_vm1, %v96_v34  ;;  %v244_v38 = vsel %vm193_vm7, %v333_v36, 0.0  ;;  %v88_v52 = vsel %vm40_vm2, 0.0, %v87_v47 }
 0x253   :  { %245 = vadd.xlane.f32.xlu0 %v244_v38  ;;  %v89_v53 = vsel %vm48_vm1, %v88_v52, -inf }
 0x254   :  { %367 = vpow2.f32 %v76_v37 }
 0x25e   :  { %v368_v39 = vpop.eup %367 }
 0x25f   :  { %v78_v40 = vsel %vm48_vm1, %v368_v39, 0.0 }
 0x260   :  { %79 = vadd.xlane.f32.xlu1 %v78_v40 }
 0x2e0   :  { %v246_v26 = vpop.xlane.xlu0 %245 }
 0x2e1   :  { %v247_v27 = vrot.slane %v246_v26, 4 }
 0x2e3   :  { %v248_v28 = vadd.f32 %v247_v27, %v246_v26 }
 0x2ed   :  { %v80_v41 = vpop.xlane.xlu1 %79 }
 0x2ee   :  { %369 = vlog2.f32 %v80_v41 }
 0x2f8   :  { %v370_v43 = vpop.eup %369 }
 0x2f9   :  { %v82_v45 = vmul.f32 0.6931472, %v370_v43 }
 0x2fb   :  { %v83_v51 = vadd.f32 %v82_v45, %v74_v30 }
 0x2fd   :  { %v84_v54 = vsub.f32 %v83_v51, %v51_v29  ;;  %v249_v29 = vrot.slane %v248_v28, 2 }
 0x2ff   :  { %v194_v55 = vsel %vm193_vm7, %v84_v54, 0.0  ;;  %v250_v33 = vadd.f32 %v249_v29, %v248_v28 }
 0x301   :  { %v251_v36 = vrot.slane %v250_v33, 1 }
 0x303   :  { %v252_v39 = vadd.f32 %v251_v36, %v250_v33 }
 0x325   :  { %v168_v46 = vpop.f32.mrb[0].mxu0 }
 0x326   :  { %v172_v48 = vmul.f32 %v168_v46, %v96_v34  ;;  %v343_v49 = vpop.f32.mrb[1].mxu0 }
 0x328   :  { %v173_v50 = vsel %vm48_vm1, %v172_v48, 0.0 }
 0x329   :  { %174 = vadd.xlane.f32.xlu1 %v173_v50 }
 0x32d   :  { %90 = vmax.xlane.f32.xlu1 %v89_v53 }
 0x331   :  { %195 = vadd.xlane.f32.xlu1 %v194_v55 }
 0x3b6   :  { %v175_v56 = vpop.xlane.xlu1 %174 }
 0x3b7   :  { %v176_v57 = vadd.f32 1e-06, %v175_v56 }
 0x3b9   :  { %371 = vrsqrt.f32 %v176_v57  ;;  %vm179_vm9 = vcmp.eq.f32.partialorder %v176_v57, inf  ;;  %v182_v2 = vand.u32 2147483648, %v176_v57  ;;  %vm181_vm10 = vcmp.eq.f32.partialorder %v176_v57, 0.0 }
 0x3ba   :  { %v91_v58 = vpop.xlane.xlu1 %90 }
 0x3bb   :  { %v210_v59 = vsel %vm193_vm7, %v91_v58, 0.0 }
 0x3bc   :  { %211 = vadd.xlane.f32.xlu1 %v210_v59 }
 0x3be   :  { %v196_v60 = vpop.xlane.xlu1 %195 }
 0x3bf   :  { %v197_v61 = vrot.slane %v196_v60, 4 }
 0x3c1   :  { %v198_v62 = vadd.f32 %v197_v61, %v196_v60 }
 0x3c3   :  { %v372_v63 = vpop.eup %371  ;;  %v199_v0 = vrot.slane %v198_v62, 2 }
 0x3c4   :  { %v178_v1 = vmul.f32 %v372_v63, %v176_v57 }
 0x3c5   :  { %v200_v4 = vadd.f32 %v199_v0, %v198_v62 }
 0x3c6   :  { %v180_v5 = vsel %vm179_vm9, %v176_v57, %v178_v1  ;;  %v299_v57 = vshrl.u32 %v35_v3, 7 }
 0x3c7   :  { %v201_v6 = vrot.slane %v200_v4, 1  ;;  %v183_v7 = vsel %vm181_vm10, %v182_v2, %v180_v5 }
 0x3c8   :  { %v184_v8 = vadd.f32 1e-06, %v183_v7  ;;  %v300_v61 = vsub.s32 0, %v299_v57 }
 0x3c9   :  { %v202_v9 = vadd.f32 %v201_v6, %v200_v4 }
 0x3ca   :  { %373 = vrcp.f32 %v184_v8 }
 0x3cb   :  { %347 = vpush %v202_v9 }
 0x3d4   :  { %v374_v10 = vpop.eup %373 }
 0x3d5   :  { %v187_v11 = vmul.f32 %v374_v10, %v495_v31 }
 0x3d7   :  { %v188_v12 = vadd.f32 1.0, %v187_v11 }
 0x3d9   :  { %v189_v13 = vmax.f32 %v188_v12, 0.0 }
 0x3db   :  { %v226_v14 = vsel %vm190_vm8, %v189_v13, 0.0 }
 0x3dc   :  { %v227_v15 = vsel %vm193_vm7, %v226_v14, 0.0 }
 0x3dd   :  { %228 = vadd.xlane.f32.xlu1 %v227_v15 }
 0x3fc   :  { %s348_s2 = spop %347 }
 0x3fd   :  { %v204_v17 = vstv %s348_s2 }
 0x3fe   :  { %v205_v18 = vadd.f32 %v204_v17, %v191_v16 }
 0x400   :  { %207 = vst.msk [vmem:[#allocation2] sm:$0x1] %vm206_vm11, %v205_v18 }
 0x407   :  { %v208_v40 = vld [vmem:[#allocation2] sm:$0x1] }
 0x449   :  { %v212_v19 = vpop.xlane.xlu1 %211 }
 0x44a   :  { %v213_v20 = vrot.slane %v212_v19, 4 }
 0x44c   :  { %v214_v21 = vadd.f32 %v213_v20, %v212_v19 }
 0x44e   :  { %v215_v22 = vrot.slane %v214_v21, 2 }
 0x450   :  { %v216_v23 = vadd.f32 %v215_v22, %v214_v21 }
 0x452   :  { %v217_v24 = vrot.slane %v216_v23, 1 }
 0x454   :  { %v218_v25 = vadd.f32 %v217_v24, %v216_v23 }
 0x456   :  { %349 = vpush %v218_v25 }
 0x46a   :  { %v229_v30 = vpop.xlane.xlu1 %228 }
 0x46b   :  { %v230_v31 = vrot.slane %v229_v30, 4 }
 0x46d   :  { %v231_v32 = vadd.f32 %v230_v31, %v229_v30 }
 0x46f   :  { %v232_v34 = vrot.slane %v231_v32, 2 }
 0x471   :  { %v233_v35 = vadd.f32 %v232_v34, %v231_v32 }
 0x473   :  { %v234_v37 = vrot.slane %v233_v35, 1 }
 0x475   :  { %v235_v38 = vadd.f32 %v234_v37, %v233_v35 }
 0x477   :  { %351 = vpush %v235_v38 }
 0x478   :  { %353 = vpush %v252_v39 }
 0x487   :  { %s350_s28 = spop %349 }
 0x488   :  { %v220_v41 = vstv %s350_s28 }
 0x489   :  { %v221_v42 = vadd.f32 %v220_v41, %v208_v40 }
 0x48b   :  { %223 = vst.msk [vmem:[#allocation2] sm:$0x1] %vm222_vm12, %v221_v42 }
 0x492   :  { %v224_v43 = vld [vmem:[#allocation2] sm:$0x1] }
 0x4a8   :  { %s352_s29 = spop %351 }
 0x4a9   :  { %v237_v44 = vstv %s352_s29  ;;  %s354_s30 = spop %353 }
 0x4aa   :  { %v238_v45 = vadd.f32 %v237_v44, %v224_v43  ;;  %v254_v47 = vstv %s354_s30 }
 0x4ac   :  { %240 = vst.msk [vmem:[#allocation2] sm:$0x1] %vm239_vm13, %v238_v45 }
 0x4b3   :  { %v241_v46 = vld [vmem:[#allocation2] sm:$0x1] }
 0x4b4   :  { %v255_v48 = vadd.f32 %v254_v47, %v241_v46 }
 0x4b6   :  { %257 = vst.msk [vmem:[#allocation2] sm:$0x1] %vm256_vm14, %v255_v48 }
 0x4bd   :  { %v261_v49 = vld [vmem:[#allocation2] sm:$0x1] }
 0x4be   :  { %v270_v50 = vmax.f32 %v261_v49, 1.0  ;;  %v262_v51 = vmul.f32 0.125, %v261_v49  ;;  %vm277_vm15 = vcmp.gt.f32.partialorder %v261_v49, 0.0 }
 0x4c0   :  { %272 = vrot.lane.b32.xlu1 %v270_v50, %s430_s4  ;;  %v264_v52 = vmul.f32 0.2, %v262_v51  ;;  %v263_v54 = vmul.f32 0.8, %v262_v51  ;;  %v278_v59 = vmul.f32 0.6, %v262_v51  ;;  %v310_v0 = vrot.slane %v262_v51, %v300_v61 }
 0x4c2   :  { %266 = vrot.lane.b32.xlu0 %v264_v52, %s430_s4 }
 0x532   :  { %v273_v53 = vpop.permute.xlu1 %272 }
 0x533   :  { %375 = vrcp.f32 %v273_v53 }
 0x534   :  { %v267_v55 = vpop.permute.xlu0 %266 }
 0x535   :  { %v269_v56 = vadd.f32 %v267_v55, %v263_v54 }
 0x537   :  { %v279_v58 = vmul.f32 0.2, %v269_v56 }
 0x539   :  { %v287_v60 = vadd.f32 %v279_v58, %v263_v54  ;;  %v280_v62 = vadd.f32 %v279_v58, %v278_v59 }
 0x53b   :  { %293 = vrot.lane.b32.xlu0 %v287_v60, %s431_s5 }
 0x53d   :  { %v376_v63 = vpop.eup %375 }
 0x53e   :  { %v276_v1 = vmul.f32 %v376_v63, %v261_v49 }
 0x53f   :  { %311 = vrot.lane.b32.xlu0 %v310_v0, %s432_s6 }
 0x540   :  { %v281_v2 = vmul.f32 0.2, %v276_v1 }
 0x542   :  { %283 = vrot.lane.b32.xlu1 %v281_v2, %s433_s7 }
 0x5ad   :  { %v294_v6 = vpop.permute.xlu0 %293 }
 0x5b1   :  { %v312_v10 = vpop.permute.xlu0 %311 }
 0x5b4   :  { %v284_v4 = vpop.permute.xlu1 %283 }
 0x5b5   :  { %v286_v5 = vadd.f32 %v284_v4, %v280_v62 }
 0x5b7   :  { %289 = vrot.lane.b32.xlu1 %v286_v5, %s431_s5 }
 0x629   :  { %v290_v3 = vpop.permute.xlu1 %289 }
 0x62a   :  { %v296_v7 = vsel %vm277_vm15, %v290_v3, %v294_v6 }
 0x62b   :  { %v301_v8 = vrot.slane %v296_v7, %v300_v61 }
 0x62d   :  { %302 = vrot.lane.b32.xlu1 %v301_v8, %s434_s8 }
 0x69f   :  { %v303_v9 = vpop.permute.xlu1 %302 }
 0x6a0   :  { %305 = vst.msk [vmem:[#allocation6] sm:$0x1] %vm206_vm11, %v303_v9 }
 0x6a1   :  { %314 = vst.msk [vmem:[#allocation6] sm:$0x1] %vm222_vm12, %v312_v10 }
 0x6a2   :  { %410 = shalt.err (!%p407_p12)
}
 0x6a3   :  { %s411_s15 = scalar_lea.hbm %s537_s3, 16 }
 0x6a4   :  { %p412_p13 = scmp.ne.s32.totalorder %s537_s3, %s411_s15  ;;  %p415_p0 = scmp.lt.u32.totalorder %s411_s15, %s537_s3 }
 0x6a6   :  { %p417_p1 = pnand %p415_p0, %p412_p13 }
 0x6a8   :  { %420 = shalt.err (!%p417_p1)
}
 0x6a9   :  { %324 = dma.vmem_to_hbm [thread:$0]  %s322_s10, 16, %s537_s3, [#allocation5]  }
 0x6aa   :  { %423 = dma.done.wait [#allocation5], 16  }
 0x6ab   :  { %424 = vsyncadd [#allocation5], 4294967280 }
 0x6ac   :  { %328 = vsyncpa [#allocation4], 1 }
 0x6ad   :  { %329 = vsyncpa [#allocation5], 1 }

</bundles_post_ra>
